<compile_context>
chip_gen: v7x
topology: tpu7x:2x2x1
jax: 0.10.0
libtpu: 0.0.40
codegen_flags: <defaults>
</compile_context>

<pallas_src>
import jax
import jax.numpy as jnp
from jax.experimental import pallas as pl
from jax.experimental.pallas import tpu as pltpu

_MIB = 1024 * 1024


def _cdiv(a: int, b: int) -> int:
    return -(-a // b)


def _round_up(a: int, b: int) -> int:
    return _cdiv(a, b) * b


def _linear_kernel(x_ref, w_ref, b_ref, o_ref):
    # x_ref: (TB, F) VMEM   w_ref: (1, F) VMEM   b_ref: (1,) SMEM   o_ref: (1, TB) VMEM
    acc = jax.lax.dot_general(
        w_ref[...], x_ref[...],
        dimension_numbers=(((1,), (1,)), ((), ())),   # contract feature axis: W . X^T
        preferred_element_type=jnp.float32,
    )                                                 # (1, TB) — batch on the lane axis
    o_ref[...] = (acc + b_ref[0]).astype(o_ref.dtype)


def _vmem_budgets():
    """Returns (vmem_limit_bytes, per-X-buffer byte budget), per TensorCore."""
    try:
        cap = int(pltpu.get_tpu_info().vmem_capacity_bytes)
    except Exception:
        cap = 64 * _MIB                                # conservative fallback: v7x per-TC VMEM
    cap = max(cap, 32 * _MIB)
    vmem_limit = min(cap - 8 * _MIB, 100 * _MIB)       # ~100 MiB on 128-MiB parts, 56 MiB on v7x
    x_budget = vmem_limit - 12 * _MIB                  # headroom: weight buf, output bufs, scratch
    return int(vmem_limit), int(x_budget // 2)         # X is double-buffered


def _choose_tile_batch(B: int, F: int, per_buffer_bytes: int) -> int:
    f_row_bytes = _round_up(F, 128) * 4                # lane-padded VMEM footprint of one X row
    tb = max(8, per_buffer_bytes // f_row_bytes)
    # Don't stream far past the real batch.
    tb = min(tb, _round_up(B, 128) if B >= 128 else _round_up(B, 8))
    # Keep >= ~4 grid steps so v7x's two TensorCores both get work, while tiles stay multi-MiB.
    quarter = _round_up(_cdiv(B, 4), 128)
    if quarter * f_row_bytes >= 4 * _MIB:
        tb = min(tb, quarter)
    # Alignment: multiple of 128 (unmasked lane-dense output stores) when possible, else of 8.
    if tb >= 128:
        tb = (tb // 128) * 128
    else:
        tb = max(8, (tb // 8) * 8)
    # TODO(synk): no K-tiling fallback — for enormous F even a TB=8 slab may not fit VMEM.
    return int(tb)


@jax.jit
def logistic_regression_forward(x, weight, bias):
    """x: (B, F) f32; weight: (1, F) f32 (PyTorch nn.Linear layout); bias: (1,) f32.
    Returns (B, 1) f32, matching nn.Linear(F, 1)(x)."""
    B, F = x.shape
    vmem_limit, per_buffer = _vmem_budgets()
    tb = _choose_tile_batch(B, F, per_buffer)
    num_tiles = _cdiv(B, tb)                 # ragged last X block handled by Pallas — no jnp.pad
    b_pad = num_tiles * tb

    out = pl.pallas_call(
        _linear_kernel,
        out_shape=jax.ShapeDtypeStruct((1, b_pad), x.dtype),
        grid_spec=pltpu.PrefetchScalarGridSpec(
            num_scalar_prefetch=0,
            grid=(num_tiles,),
            in_specs=[
                pl.BlockSpec((tb, F), lambda i: (i, 0)),             # X tile, double-buffered
                pl.BlockSpec((1, F), lambda i: (0, 0)),              # weight, resident
                pl.BlockSpec(memory_space=pltpu.MemorySpace.SMEM),   # bias scalar in SMEM
            ],
            out_specs=pl.BlockSpec((1, tb), lambda i: (0, i)),       # lane-dense row slab
        ),
        compiler_params=pltpu.CompilerParams(
            dimension_semantics=("parallel",),    # v7x: shard batch tiles over both TCs
            vmem_limit_bytes=vmem_limit,
        ),
        cost_estimate=pl.CostEstimate(
            flops=2 * B * F,
            transcendentals=0,
            bytes_accessed=B * F * 4 + F * 4 + B * 4,
        ),
    )(x, weight, bias)

    # (1, b_pad) row slab -> (B, 1) column expected from nn.Linear (garbage tail lanes dropped)
    return out.reshape(b_pad)[:B].reshape(B, 1)


if __name__ == "__main__":
    feature_dim = 2
    batch = 8

    key = jax.random.PRNGKey(0)
    kx, kw, kb = jax.random.split(key, 3)

    # Deterministic init mirroring nn.Linear default: U(-1/sqrt(fan_in), 1/sqrt(fan_in))
    bound = 1.0 / (feature_dim ** 0.5)
    weight = jax.random.uniform(kw, (1, feature_dim), jnp.float32, -bound, bound)
    bias = jax.random.uniform(kb, (1,), jnp.float32, -bound, bound)

    x = jax.random.normal(kx, (batch, feature_dim), jnp.float32)

    y = logistic_regression_forward(x, weight, bias)
    y = jax.block_until_ready(y)

    # Reference check in plain JAX (same math as nn.Linear forward; no sigmoid in the module)
    y_ref = x @ weight.T + bias
    assert y.shape == (batch, 1)
    assert jnp.allclose(y, y_ref, atol=1e-5, rtol=1e-5)

    print("KERNEL_OK")
</pallas_src>

<mosaic_0001>
module attributes {stable_mosaic.version = 11 : i64} {
  func.func @_linear_kernel(%arg0: i32, %arg1: memref<8x2xf32, #tpu.memory_space<vmem>>, %arg2: memref<1x2xf32, #tpu.memory_space<vmem>>, %arg3: memref<1xf32, #tpu.memory_space<smem>>, %arg4: memref<1x8xf32, #tpu.memory_space<vmem>>) attributes {dimension_semantics = [#tpu.dimension_semantics<parallel>], iteration_bounds = array<i64: 1>, scalar_prefetch = 0 : i64, scratch_operands = 0 : i64, tpu.core_type = #tpu.core_type<tc>, window_params = [{transform_indices = @transform_0, window_bounds = array<i64: 8, 2>}, {pipeline_mode = #tpu.pipeline_mode<synchronous>, transform_indices = @transform_1, window_bounds = array<i64: 1, 2>}, {transform_indices = @transform_2, window_bounds = array<i64: 1>}, {transform_indices = @transform_3, window_bounds = array<i64: 1, 8>}]} {
    %c0 = arith.constant 0 : index
    %c0_0 = arith.constant 0 : index
    %0 = vector.load %arg2[%c0, %c0_0] : memref<1x2xf32, #tpu.memory_space<vmem>>, vector<1x2xf32>
    %c0_1 = arith.constant 0 : index
    %c0_2 = arith.constant 0 : index
    %1 = vector.load %arg1[%c0_1, %c0_2] : memref<8x2xf32, #tpu.memory_space<vmem>>, vector<8x2xf32>
    %cst = arith.constant dense<0.000000e+00> : vector<1x8xf32>
    %2 = tpu.matmul %0, %1, %cst {dimension_numbers = #tpu.dot_dimension_numbers<[1], [1], [0], [0], [0, 0, 1, 0], [], []>} : vector<1x2xf32>, vector<8x2xf32>, vector<1x8xf32> -> vector<1x8xf32>
    %c0_3 = arith.constant 0 : index
    %3 = memref.load %arg3[%c0_3] : memref<1xf32, #tpu.memory_space<smem>>
    %4 = vector.broadcast %3 : f32 to vector<1x8xf32>
    %5 = arith.addf %2, %4 : vector<1x8xf32>
    %c0_4 = arith.constant 0 : index
    %c0_5 = arith.constant 0 : index
    %6 = vector.load %arg4[%c0_4, %c0_5] : memref<1x8xf32, #tpu.memory_space<vmem>>, vector<1x8xf32>
    tpu.vector_store %arg4[%c0_4, %c0_5], %5 {strides = array<i32>} : memref<1x8xf32, #tpu.memory_space<vmem>>, vector<1x8xf32>,
    return
  }
  func.func @transform_0(%arg0: i32) -> (i32, i32) {
    %c0_i32 = arith.constant 0 : i32
    %c0_i32_0 = arith.constant 0 : i32
    return %arg0, %c0_i32 : i32, i32
  }
  func.func @transform_1(%arg0: i32) -> (i32, i32) {
    %c0_i32 = arith.constant 0 : i32
    %c0_i32_0 = arith.constant 0 : i32
    %c0_i32_1 = arith.constant 0 : i32
    return %c0_i32, %c0_i32_0 : i32, i32
  }
  func.func @transform_2(%arg0: i32) -> i32 {
    %c0_i32 = arith.constant 0 : i32
    %c0_i32_0 = arith.constant 0 : i32
    return %c0_i32 : i32
  }
  func.func @transform_3(%arg0: i32) -> (i32, i32) {
    %c0_i32 = arith.constant 0 : i32
    %c0_i32_0 = arith.constant 0 : i32
    return %c0_i32, %arg0 : i32, i32
  }
}

</mosaic_0001>

<bundles_post_ra>
// kernel: logistic_regression_forward.1
= control target key start
LH: loop header
LB: loop body
LE: loop exit
PB: predicated region body
PF: predicated region fallthrough
CT: control target
= control target key end

     0   :  { %vm20_vm0 = vcmask 15360   ;;  %v149_v1 = vmov 0.0   ;;  %vm150_vm1 = vmmov 0   ;;  %s193_s0 = inlined_call_operand.vmem [shape: f32[8,2], index: 0, kind: input, shape index: {}]   ;;  %s194_s1 = inlined_call_operand.vmem [shape: f32[1,2], index: 1, kind: input, shape index: {}]   ;;  %s195_s2 = inlined_call_operand.<no memory space> [shape: f32[1], index: 2, kind: input, shape index: {}]   ;;  %s196_s3 = inlined_call_operand.hbm [shape: f32[1,8], index: 3, kind: output, shape index: {}]  }
   0x1   :  { %v17_v0 = vld [vmem:[%s193_s0] sm:$0xff]  ;;  %117 = vmatprep.subr.mxu0 %v149_v1  ;;  %119 = vmatprep.mubr.msk.f32.mxu0 %vm150_vm1, %v149_v1 }
   0x2   :  { %9 = vsyncpa [#allocation4], 0  ;;  %118 = vmatpush3.xpose.msk.msra.mxu0 %vm20_vm0, %v17_v0  ;;  %v16_v2 = vld [vmem:[%s194_s1] sm:$0x1]  ;;  %v19_v3 = vstv %s195_s2  ;;  %s151_s18 = smov [#allocation3]   ;;  %vm97_vm2 = vcmask 57344  }
   0x3   :  { %s105_s19 = sshll.u32 %s151_s18, 4  ;;  %s106_s19 = int_to_ptr.vmem [resolvable:$true] %s105_s19 }
   0x4   :  { %s125_s0 = scalar_lea.vmem %s106_s19, 16  ;;  %s129_s20 = scalar_lea.vmem %s106_s19, 32 }
   0x5   :  { %120 = vmatmul.mubr.msk.f32.vlgmr.msra.gmra.mrb[0].mxu0 %vm20_vm0, %v16_v2  ;;  %p126_p0 = scmp.ne.s32.totalorder %s106_s19, %s125_s0  ;;  %p130_p1 = scmp.lt.s32.totalorder %s106_s19, %s106_s19 }
   0x6   :  { %p131_p2 = scmp.lt.s32.totalorder %s129_s20, %s125_s0 }
   0x8   :  { %p132_p3 = por %p131_p2, %p130_p1 }
   0xa   :  { %p133_p4 = pnand %p132_p3, %p126_p0 }
  0xd8   :  { %v93_v4 = vpop.f32.mrb[0].mxu0 }
  0xd9   :  { %v94_v5 = vadd.f32 %v93_v4, %v19_v3  ;;  %v121_v6 = vpop.f32.mrb[1].mxu0 }
  0xdb   :  { %98 = vst.msk [vmem:[#allocation3] sm:$0x1] %vm97_vm2, %v94_v5 }
  0xdc   :  { %136 = shalt.err (!%p133_p4)
}
  0xdd   :  { %s137_s2 = scalar_lea.hbm %s196_s3, 16 }
  0xde   :  { %p138_p5 = scmp.ne.s32.totalorder %s196_s3, %s137_s2  ;;  %p141_p6 = scmp.lt.u32.totalorder %s137_s2, %s196_s3 }
  0xe0   :  { %p143_p7 = pnand %p141_p6, %p138_p5 }
  0xe2   :  { %146 = shalt.err (!%p143_p7)
}
  0xe3   :  { %108 = dma.vmem_to_hbm [thread:$0]  %s106_s19, 16, %s196_s3, [#allocation4]  }
  0xe4   :  { %147 = dma.done.wait [#allocation4], 16  }
  0xe5   :  { %148 = vsyncadd [#allocation4], 4294967280 }
  0xe6   :  { %112 = vsyncpa [#allocation4], 1 }

</bundles_post_ra>
